<compile_context>
chip_gen: v5e
topology: v5e:2x2
jax: 0.10.0
libtpu: 0.0.40
codegen_flags: <defaults>
</compile_context>

<pallas_src>
import functools

import jax
import jax.numpy as jnp
from jax import lax
from jax.experimental import pallas as pl
from jax.experimental.pallas import tpu as pltpu


def capsule_kernel(x_ref, w_ref, p_ref, o_ref, *, num_capsules, out_features):
    C, D = num_capsules, out_features

    x = x_ref[...]        # (B, F)
    w = w_ref[...]        # (F, C*D)
    p = p_ref[...]        # (2, C*D): row 0 = gamma, row 1 = beta
    gamma = p[0:1, :]     # (1, C*D)
    beta = p[1:2, :]      # (1, C*D)

    # Fused linear over all capsules: (B, F) @ (F, C*D) on the MXU.
    # The nn.Linear bias is intentionally omitted: the training-mode BN mean
    # subtraction below cancels any per-column constant exactly.
    y = jnp.dot(x, w, preferred_element_type=jnp.float32)        # (B, C*D)

    # BatchNorm1d, training mode (biased batch variance, eps = 1e-5),
    # single pass over y for both statistics.
    inv_b = 1.0 / y.shape[0]
    s1 = jnp.sum(y, axis=0, keepdims=True)                       # (1, C*D)
    s2 = jnp.sum(y * y, axis=0, keepdims=True)                   # (1, C*D)
    mean = s1 * inv_b
    var = s2 * inv_b - mean * mean
    y = gamma * ((y - mean) * lax.rsqrt(var + 1e-5)) + beta      # (B, C*D)

    # Squash per capsule on static 128-aligned lane slices (no reshape /
    # cross-lane relayout). C is tiny (4), a static Python loop is fine;
    # switch to lax.fori_loop(..., unroll=True) if C grows.
    for c in range(C):
        yc = y[:, c * D:(c + 1) * D]                             # (B, D)
        sq = jnp.sum(yc * yc, axis=-1, keepdims=True)            # (B, 1)
        # sq / ((1 + sq) * sqrt(sq + eps)) with a single EUP rsqrt push.
        one_p = 1.0 + sq
        factor = sq * lax.rsqrt((sq + 1e-7) * one_p * one_p)
        o_ref[:, c * D:(c + 1) * D] = (yc * factor).astype(o_ref.dtype)


def prepare_params(w, gamma, beta):
    """One-time (init-time) parameter layout transform.

    w: (C, F, D) -> (F, C*D) where column c*D + d is W[c, :, d].
    gamma, beta: (C, 1, D) -> packed (2, C*D).
    """
    C, F, D = w.shape
    w_flat = jnp.transpose(w, (1, 0, 2)).reshape(F, C * D)
    bn_params = jnp.stack(
        [gamma.reshape(C * D), beta.reshape(C * D)], axis=0)     # (2, C*D)
    return w_flat, bn_params


def capsule_layer(x, w_flat, bn_params, *, num_capsules, out_features):
    """x: (B, F); w_flat: (F, C*D); bn_params: (2, C*D). Returns (B, C, D)."""
    B = x.shape[0]
    C, D = num_capsules, out_features

    kernel = functools.partial(
        capsule_kernel, num_capsules=C, out_features=D)

    # Whole problem fits comfortably in VMEM at these sizes -> single
    # invocation, whole arrays resident, no grid / auto-pipelining needed.
    vmem = lambda: pl.BlockSpec(memory_space=pltpu.MemorySpace.VMEM)
    out_flat = pl.pallas_call(
        kernel,
        out_shape=jax.ShapeDtypeStruct((B, C * D), jnp.float32),
        in_specs=[vmem(), vmem(), vmem()],
        out_specs=vmem(),
    )(x, w_flat, bn_params)

    # Lane-dense (B, C*D) -> free row-major reshape to (B, C, D).
    return out_flat.reshape(B, C, D)


def reference(x, w, b, gamma, beta):
    # Pure-JAX reference. Keeps the Linear bias to verify it indeed cancels
    # under training-mode BN. HIGHEST precision so the comparison is f32-f32.
    y = jnp.einsum("bf,cfd->cbd", x, w,
                   precision=lax.Precision.HIGHEST) + b          # (C, B, D)
    mean = jnp.mean(y, axis=1, keepdims=True)
    var = jnp.mean((y - mean) ** 2, axis=1, keepdims=True)
    y = gamma * ((y - mean) / jnp.sqrt(var + 1e-5)) + beta
    sq = jnp.sum(y * y, axis=-1, keepdims=True)
    out = (sq / (1.0 + sq)) * y / jnp.sqrt(sq + 1e-7)
    return jnp.transpose(out, (1, 0, 2))                         # (B, C, D)


if __name__ == "__main__":
    B = 8            # batch
    F = 32           # num_features
    D = 128          # out_features
    C = 4            # num_capsules

    key = jax.random.PRNGKey(0)
    kx, kw, kb = jax.random.split(key, 3)

    x = jax.random.normal(kx, (B, F), dtype=jnp.float32)

    # PyTorch nn.Linear default init: U(-1/sqrt(F), 1/sqrt(F))
    bound = 1.0 / jnp.sqrt(jnp.float32(F))
    w = jax.random.uniform(kw, (C, F, D), jnp.float32, -bound, bound)
    b = jax.random.uniform(kb, (C, 1, D), jnp.float32, -bound, bound)
    # BatchNorm1d default affine params
    gamma = jnp.ones((C, 1, D), jnp.float32)
    beta = jnp.zeros((C, 1, D), jnp.float32)

    # Init-time parameter layout transform (kept out of the per-call path).
    w_flat, bn_params = prepare_params(w, gamma, beta)

    out = jax.block_until_ready(
        capsule_layer(x, w_flat, bn_params, num_capsules=C, out_features=D))

    ref = reference(x, w, b, gamma, beta)
    assert out.shape == (B, C, D)
    # Exact-math squash factor (no approx reciprocal) -> tolerance tightened
    # 20x vs. the previous 1e-3; observed agreement is ~1e-6, margin covers
    # the one-pass variance and f32 MXU multi-pass rounding.
    assert jnp.allclose(out, ref, atol=5e-5, rtol=5e-5)

    print("KERNEL_OK")
</pallas_src>

<mosaic_0001>
module attributes {stable_mosaic.version = 11 : i64} {
  func.func @capsule_kernel(%arg0: memref<8x32xf32, #tpu.memory_space<vmem>>, %arg1: memref<32x512xf32, #tpu.memory_space<vmem>>, %arg2: memref<2x512xf32, #tpu.memory_space<vmem>>, %arg3: memref<8x512xf32, #tpu.memory_space<vmem>>) attributes {dimension_semantics = [], scalar_prefetch = 0 : i64, scratch_operands = 0 : i64, tpu.core_type = #tpu.core_type<tc>} {
    %c0 = arith.constant 0 : index
    %c0_0 = arith.constant 0 : index
    %0 = vector.load %arg0[%c0, %c0_0] : memref<8x32xf32, #tpu.memory_space<vmem>>, vector<8x32xf32>
    %c0_1 = arith.constant 0 : index
    %c0_2 = arith.constant 0 : index
    %1 = vector.load %arg1[%c0_1, %c0_2] : memref<32x512xf32, #tpu.memory_space<vmem>>, vector<32x512xf32>
    %c0_3 = arith.constant 0 : index
    %c0_4 = arith.constant 0 : index
    %2 = vector.load %arg2[%c0_3, %c0_4] : memref<2x512xf32, #tpu.memory_space<vmem>>, vector<2x512xf32>
    %3 = vector.extract_strided_slice %2 {offsets = [0, 0], sizes = [1, 512], strides = [1, 1]} : vector<2x512xf32> to vector<1x512xf32>
    %4 = vector.extract_strided_slice %2 {offsets = [1, 0], sizes = [1, 512], strides = [1, 1]} : vector<2x512xf32> to vector<1x512xf32>
    %cst = arith.constant dense<0.000000e+00> : vector<8x512xf32>
    %5 = tpu.matmul %0, %1, %cst {dimension_numbers = #tpu.dot_dimension_numbers<[1], [0], [0], [1], [0, 0, 1, 1], [], []>} : vector<8x32xf32>, vector<32x512xf32>, vector<8x512xf32> -> vector<8x512xf32>
    %cst_5 = arith.constant dense<0.000000e+00> : vector<512xf32>
    %6 = vector.multi_reduction <add>, %5, %cst_5 [0] : vector<8x512xf32> to vector<512xf32>
    %7 = vector.shape_cast %6 : vector<512xf32> to vector<1x512xf32>
    %8 = arith.mulf %5, %5 : vector<8x512xf32>
    %cst_6 = arith.constant dense<0.000000e+00> : vector<512xf32>
    %9 = vector.multi_reduction <add>, %8, %cst_6 [0] : vector<8x512xf32> to vector<512xf32>
    %10 = vector.shape_cast %9 : vector<512xf32> to vector<1x512xf32>
    %cst_7 = arith.constant 1.250000e-01 : f32
    %11 = vector.broadcast %cst_7 : f32 to vector<1x512xf32>
    %12 = arith.mulf %7, %11 : vector<1x512xf32>
    %cst_8 = arith.constant 1.250000e-01 : f32
    %13 = vector.broadcast %cst_8 : f32 to vector<1x512xf32>
    %14 = arith.mulf %10, %13 : vector<1x512xf32>
    %15 = arith.mulf %12, %12 : vector<1x512xf32>
    %16 = arith.subf %14, %15 : vector<1x512xf32>
    %17 = vector.broadcast %12 : vector<1x512xf32> to vector<8x512xf32>
    %18 = arith.subf %5, %17 : vector<8x512xf32>
    %cst_9 = arith.constant 9.99999974E-6 : f32
    %19 = vector.broadcast %cst_9 : f32 to vector<1x512xf32>
    %20 = arith.addf %16, %19 : vector<1x512xf32>
    %21 = math.rsqrt %20 : vector<1x512xf32>
    %22 = vector.broadcast %21 : vector<1x512xf32> to vector<8x512xf32>
    %23 = arith.mulf %18, %22 : vector<8x512xf32>
    %24 = vector.broadcast %3 : vector<1x512xf32> to vector<8x512xf32>
    %25 = arith.mulf %24, %23 : vector<8x512xf32>
    %26 = vector.broadcast %4 : vector<1x512xf32> to vector<8x512xf32>
    %27 = arith.addf %25, %26 : vector<8x512xf32>
    %28 = vector.extract_strided_slice %27 {offsets = [0, 0], sizes = [8, 128], strides = [1, 1]} : vector<8x512xf32> to vector<8x128xf32>
    %29 = arith.mulf %28, %28 : vector<8x128xf32>
    %cst_10 = arith.constant dense<0.000000e+00> : vector<8xf32>
    %30 = vector.multi_reduction <add>, %29, %cst_10 [1] : vector<8x128xf32> to vector<8xf32>
    %31 = vector.shape_cast %30 : vector<8xf32> to vector<8x1xf32>
    %cst_11 = arith.constant 1.000000e+00 : f32
    %32 = vector.broadcast %cst_11 : f32 to vector<8x1xf32>
    %33 = arith.addf %32, %31 : vector<8x1xf32>
    %cst_12 = arith.constant 1.000000e-07 : f32
    %34 = vector.broadcast %cst_12 : f32 to vector<8x1xf32>
    %35 = arith.addf %31, %34 : vector<8x1xf32>
    %36 = arith.mulf %35, %33 : vector<8x1xf32>
    %37 = arith.mulf %36, %33 : vector<8x1xf32>
    %38 = math.rsqrt %37 : vector<8x1xf32>
    %39 = arith.mulf %31, %38 : vector<8x1xf32>
    %40 = vector.broadcast %39 : vector<8x1xf32> to vector<8x128xf32>
    %41 = arith.mulf %28, %40 : vector<8x128xf32>
    %c0_13 = arith.constant 0 : index
    %c0_14 = arith.constant 0 : index
    %42 = vector.load %arg3[%c0_13, %c0_14] : memref<8x512xf32, #tpu.memory_space<vmem>>, vector<8x128xf32>
    tpu.vector_store %arg3[%c0_13, %c0_14], %41 {strides = array<i32>} : memref<8x512xf32, #tpu.memory_space<vmem>>, vector<8x128xf32>,
    %43 = vector.extract_strided_slice %27 {offsets = [0, 128], sizes = [8, 128], strides = [1, 1]} : vector<8x512xf32> to vector<8x128xf32>
    %44 = arith.mulf %43, %43 : vector<8x128xf32>
    %cst_15 = arith.constant dense<0.000000e+00> : vector<8xf32>
    %45 = vector.multi_reduction <add>, %44, %cst_15 [1] : vector<8x128xf32> to vector<8xf32>
    %46 = vector.shape_cast %45 : vector<8xf32> to vector<8x1xf32>
    %cst_16 = arith.constant 1.000000e+00 : f32
    %47 = vector.broadcast %cst_16 : f32 to vector<8x1xf32>
    %48 = arith.addf %47, %46 : vector<8x1xf32>
    %cst_17 = arith.constant 1.000000e-07 : f32
    %49 = vector.broadcast %cst_17 : f32 to vector<8x1xf32>
    %50 = arith.addf %46, %49 : vector<8x1xf32>
    %51 = arith.mulf %50, %48 : vector<8x1xf32>
    %52 = arith.mulf %51, %48 : vector<8x1xf32>
    %53 = math.rsqrt %52 : vector<8x1xf32>
    %54 = arith.mulf %46, %53 : vector<8x1xf32>
    %55 = vector.broadcast %54 : vector<8x1xf32> to vector<8x128xf32>
    %56 = arith.mulf %43, %55 : vector<8x128xf32>
    %c0_18 = arith.constant 0 : index
    %c128 = arith.constant 128 : index
    %57 = vector.load %arg3[%c0_18, %c128] : memref<8x512xf32, #tpu.memory_space<vmem>>, vector<8x128xf32>
    tpu.vector_store %arg3[%c0_18, %c128], %56 {strides = array<i32>} : memref<8x512xf32, #tpu.memory_space<vmem>>, vector<8x128xf32>,
    %58 = vector.extract_strided_slice %27 {offsets = [0, 256], sizes = [8, 128], strides = [1, 1]} : vector<8x512xf32> to vector<8x128xf32>
    %59 = arith.mulf %58, %58 : vector<8x128xf32>
    %cst_19 = arith.constant dense<0.000000e+00> : vector<8xf32>
    %60 = vector.multi_reduction <add>, %59, %cst_19 [1] : vector<8x128xf32> to vector<8xf32>
    %61 = vector.shape_cast %60 : vector<8xf32> to vector<8x1xf32>
    %cst_20 = arith.constant 1.000000e+00 : f32
    %62 = vector.broadcast %cst_20 : f32 to vector<8x1xf32>
    %63 = arith.addf %62, %61 : vector<8x1xf32>
    %cst_21 = arith.constant 1.000000e-07 : f32
    %64 = vector.broadcast %cst_21 : f32 to vector<8x1xf32>
    %65 = arith.addf %61, %64 : vector<8x1xf32>
    %66 = arith.mulf %65, %63 : vector<8x1xf32>
    %67 = arith.mulf %66, %63 : vector<8x1xf32>
    %68 = math.rsqrt %67 : vector<8x1xf32>
    %69 = arith.mulf %61, %68 : vector<8x1xf32>
    %70 = vector.broadcast %69 : vector<8x1xf32> to vector<8x128xf32>
    %71 = arith.mulf %58, %70 : vector<8x128xf32>
    %c0_22 = arith.constant 0 : index
    %c256 = arith.constant 256 : index
    %72 = vector.load %arg3[%c0_22, %c256] : memref<8x512xf32, #tpu.memory_space<vmem>>, vector<8x128xf32>
    tpu.vector_store %arg3[%c0_22, %c256], %71 {strides = array<i32>} : memref<8x512xf32, #tpu.memory_space<vmem>>, vector<8x128xf32>,
    %73 = vector.extract_strided_slice %27 {offsets = [0, 384], sizes = [8, 128], strides = [1, 1]} : vector<8x512xf32> to vector<8x128xf32>
    %74 = arith.mulf %73, %73 : vector<8x128xf32>
    %cst_23 = arith.constant dense<0.000000e+00> : vector<8xf32>
    %75 = vector.multi_reduction <add>, %74, %cst_23 [1] : vector<8x128xf32> to vector<8xf32>
    %76 = vector.shape_cast %75 : vector<8xf32> to vector<8x1xf32>
    %cst_24 = arith.constant 1.000000e+00 : f32
    %77 = vector.broadcast %cst_24 : f32 to vector<8x1xf32>
    %78 = arith.addf %77, %76 : vector<8x1xf32>
    %cst_25 = arith.constant 1.000000e-07 : f32
    %79 = vector.broadcast %cst_25 : f32 to vector<8x1xf32>
    %80 = arith.addf %76, %79 : vector<8x1xf32>
    %81 = arith.mulf %80, %78 : vector<8x1xf32>
    %82 = arith.mulf %81, %78 : vector<8x1xf32>
    %83 = math.rsqrt %82 : vector<8x1xf32>
    %84 = arith.mulf %76, %83 : vector<8x1xf32>
    %85 = vector.broadcast %84 : vector<8x1xf32> to vector<8x128xf32>
    %86 = arith.mulf %73, %85 : vector<8x128xf32>
    %c0_26 = arith.constant 0 : index
    %c384 = arith.constant 384 : index
    %87 = vector.load %arg3[%c0_26, %c384] : memref<8x512xf32, #tpu.memory_space<vmem>>, vector<8x128xf32>
    tpu.vector_store %arg3[%c0_26, %c384], %86 {strides = array<i32>} : memref<8x512xf32, #tpu.memory_space<vmem>>, vector<8x128xf32>,
    return
  }
}

</mosaic_0001>

<bundles_post_ra>
// kernel: tpu_custom_call.1
= control target key start
LH: loop header
LB: loop body
LE: loop exit
PB: predicated region body
PF: predicated region fallthrough
CT: control target
= control target key end

     0   :  { %8 = vsyncpa [#allocation3], 0  ;;  %s655_s0 = inlined_call_operand.hbm [shape: f32[8,32], index: 0, kind: input, shape index: {}]   ;;  %s656_s1 = inlined_call_operand.hbm [shape: f32[32,512], index: 1, kind: input, shape index: {}]   ;;  %s657_s2 = inlined_call_operand.hbm [shape: f32[2,512], index: 2, kind: input, shape index: {}]   ;;  %s658_s3 = inlined_call_operand.hbm [shape: f32[8,512], index: 3, kind: output, shape index: {}]  }
   0x1   :  { %9 = vsyncpa [#allocation6], 0  ;;  %s26_s14 = sshll.u32 %s656_s1, 4  ;;  %s27_s14 = int_to_ptr.hbm [resolvable:$true] %s26_s14 }
   0x2   :  { %10 = vsyncpa [#allocation4], 0  ;;  %s539_s15 = smov [#allocation5]   ;;  %s16_s19 = sshll.u32 %s655_s0, 4  ;;  %s17_s19 = int_to_ptr.hbm [resolvable:$true] %s16_s19 }
   0x3   :  { %s28_s16 = sshll.u32 %s539_s15, 4  ;;  %s540_s20 = smov 512   ;;  %s29_s16 = int_to_ptr.vmem [resolvable:$true] %s28_s16 }
   0x4   :  { %s541_s21 = smov 32   ;;  %s542_s22 = smov [#allocation2]  }
   0x5   :  { %34 = dma.hbm_to_vmem [thread:$0]  %s27_s14, 2048, %s29_s16, [#allocation6], %s540_s20, %s540_s20, %s541_s21  }
   0x6   :  { %s18_s23 = sshll.u32 %s542_s22, 4  ;;  %s40_s26 = sshll.u32 %s657_s2, 4  ;;  %s19_s23 = int_to_ptr.vmem [resolvable:$true] %s18_s23  ;;  %s41_s26 = int_to_ptr.hbm [resolvable:$true] %s40_s26 }
   0x7   :  { %21 = dma.hbm_to_vmem [thread:$0]  %s17_s19, 128, %s19_s23, [#allocation3]  }
   0x8   :  { %s543_s1 = smov [#allocation7]  }
   0x9   :  { %s42_s27 = sshll.u32 %s543_s1, 4  ;;  %s43_s27 = int_to_ptr.vmem [resolvable:$true] %s42_s27 }
   0xa   :  { %45 = dma.hbm_to_vmem [thread:$0]  %s41_s26, 128, %s43_s27, [#allocation6]  }
   0xb   :  { %533 = dma.done.wait [#allocation3], 128  }
   0xc   :  { %534 = vsyncadd [#allocation3], 4294967168 }
   0xd   :  { %535 = dma.done.wait [#allocation6], 2176  }
   0xe   :  { %536 = vsyncadd [#allocation6], 4294965120  ;;  %v71_v0 = vld [vmem:[#allocation5 + $0x60] sm:$0xff]  ;;  %v72_v1 = vld [vmem:[#allocation5 + $0x68] sm:$0xff]  ;;  %vm76_vm0 = vcmask 261120   ;;  %s544_s0 = smov [#allocation8]  }
   0xf   :  { %v73_v2 = vld [vmem:[#allocation5 + $0x70] sm:$0xff]  ;;  %92 = vmatpush.msra.mxu0 %v71_v0  ;;  %112 = vmatpush.msra.mxu1 %v72_v1  ;;  %v74_v3 = vld [vmem:[#allocation5 + $0x78] sm:$0xff]  ;;  %v67_v4 = vld [vmem:[#allocation5 + $0x40] sm:$0xff]  ;;  %s398_s2 = sshll.u32 %s544_s0, 4  ;;  %s400_s30 = sshll.u32 %s658_s3, 4  ;;  %s399_s2 = int_to_ptr.vmem [resolvable:$true] %s398_s2  ;;  %s401_s30 = int_to_ptr.hbm [resolvable:$true] %s400_s30 }
  0x10   :  { %v68_v5 = vld [vmem:[#allocation5 + $0x48] sm:$0xff]  ;;  %132 = vmatpush.msra.mxu2 %v73_v2  ;;  %152 = vmatpush.msra.mxu3 %v74_v3  ;;  %v69_v6 = vld [vmem:[#allocation5 + $0x50] sm:$0xff]  ;;  %v70_v7 = vld [vmem:[#allocation5 + $0x58] sm:$0xff] }
  0x11   :  { %v63_v8 = vld [vmem:[#allocation5 + $0x20] sm:$0xff]  ;;  %93 = vmatpush.msra.mxu0 %v67_v4  ;;  %113 = vmatpush.msra.mxu1 %v68_v5  ;;  %v64_v9 = vld [vmem:[#allocation5 + $0x28] sm:$0xff]  ;;  %v65_v10 = vld [vmem:[#allocation5 + $0x30] sm:$0xff] }
  0x12   :  { %v66_v11 = vld [vmem:[#allocation5 + $0x38] sm:$0xff]  ;;  %133 = vmatpush.msra.mxu2 %v69_v6  ;;  %153 = vmatpush.msra.mxu3 %v70_v7  ;;  %v59_v12 = vld [vmem:[#allocation5] sm:$0xff]  ;;  %v60_v13 = vld [vmem:[#allocation5 + $0x8] sm:$0xff] }
  0x13   :  { %94 = vmatpush.msra.mxu0 %v63_v8  ;;  %114 = vmatpush.msra.mxu1 %v64_v9  ;;  %v61_v14 = vld [vmem:[#allocation5 + $0x10] sm:$0xff]  ;;  %v62_v15 = vld [vmem:[#allocation5 + $0x18] sm:$0xff] }
  0x14   :  { %134 = vmatpush.msra.mxu2 %v65_v10  ;;  %154 = vmatpush.msra.mxu3 %v66_v11  ;;  %v58_v16 = vld [vmem:[#allocation2] sm:$0xff] }
  0x15   :  { %95 = vmatpush.msra.mxu0 %v59_v12  ;;  %115 = vmatpush.msra.mxu1 %v60_v13 }
  0x16   :  { %135 = vmatpush.msra.mxu2 %v61_v14  ;;  %155 = vmatpush.msra.mxu3 %v62_v15 }
  0x17   :  { %411 = vmatmul.msk.f32.vlgmr.msra.gmra.mxu0 %vm76_vm0, %v58_v16  ;;  %412 = vmatmul.msk.f32.vlgmr.msra.gmra.mxu1 %vm76_vm0, %v58_v16 }
  0x18   :  { %413 = vmatmul.msk.f32.vlgmr.msra.gmra.mxu2 %vm76_vm0, %v58_v16  ;;  %414 = vmatmul.msk.f32.vlgmr.msra.gmra.mxu3 %vm76_vm0, %v58_v16 }
  0x94   :  { %v574_v17 = vpop.f32.mrf.mxu0  ;;  %v576_v18 = vpop.f32.mrf.mxu1 }
  0x95   :  { %v160_v19 = vrot.slane %v574_v17, 4  ;;  %v184_v20 = vmul.f32 %v574_v17, %v574_v17  ;;  %v166_v21 = vrot.slane %v576_v18, 4  ;;  %v185_v22 = vmul.f32 %v576_v18, %v576_v18 }
  0x97   :  { %v161_v23 = vadd.f32 %v160_v19, %v574_v17  ;;  %v188_v24 = vrot.slane %v184_v20, 4  ;;  %v167_v25 = vadd.f32 %v166_v21, %v576_v18  ;;  %v194_v26 = vrot.slane %v185_v22, 4 }
  0x99   :  { %v162_v27 = vrot.slane %v161_v23, 2  ;;  %v189_v28 = vadd.f32 %v188_v24, %v184_v20  ;;  %v168_v29 = vrot.slane %v167_v25, 2  ;;  %v195_v30 = vadd.f32 %v194_v26, %v185_v22 }
  0x9b   :  { %v163_v31 = vadd.f32 %v162_v27, %v161_v23  ;;  %v190_v32 = vrot.slane %v189_v28, 2  ;;  %v169_v33 = vadd.f32 %v168_v29, %v167_v25  ;;  %v196_v34 = vrot.slane %v195_v30, 2  ;;  %v586_v35 = vpop.f32.mrf.mxu2  ;;  %v588_v36 = vpop.f32.mrf.mxu3 }
  0x9c   :  { %v172_v37 = vrot.slane %v586_v35, 4  ;;  %v186_v38 = vmul.f32 %v586_v35, %v586_v35  ;;  %v178_v39 = vrot.slane %v588_v36, 4  ;;  %v187_v40 = vmul.f32 %v588_v36, %v588_v36 }
  0x9d   :  { %v164_v41 = vrot.slane %v163_v31, 1  ;;  %v191_v42 = vadd.f32 %v190_v32, %v189_v28  ;;  %v170_v43 = vrot.slane %v169_v33, 1  ;;  %v197_v44 = vadd.f32 %v196_v34, %v195_v30 }
  0x9e   :  { %v173_v45 = vadd.f32 %v172_v37, %v586_v35  ;;  %v200_v46 = vrot.slane %v186_v38, 4  ;;  %v179_v47 = vadd.f32 %v178_v39, %v588_v36  ;;  %v206_v48 = vrot.slane %v187_v40, 4 }
  0x9f   :  { %v165_v49 = vadd.f32 %v164_v41, %v163_v31  ;;  %v192_v50 = vrot.slane %v191_v42, 1  ;;  %v171_v51 = vadd.f32 %v170_v43, %v169_v33  ;;  %v198_v52 = vrot.slane %v197_v44, 1 }
  0xa0   :  { %v174_v53 = vrot.slane %v173_v45, 2  ;;  %v201_v54 = vadd.f32 %v200_v46, %v186_v38  ;;  %v180_v55 = vrot.slane %v179_v47, 2  ;;  %v207_v56 = vadd.f32 %v206_v48, %v187_v40  ;;  %v614_v38 = vld [vmem:[#allocation7] sm:$0xff] }
  0xa1   :  { %v193_v57 = vadd.f32 %v192_v50, %v191_v42  ;;  %v598_v58 = vmul.f32 0.125, %v165_v49  ;;  %v199_v59 = vadd.f32 %v198_v52, %v197_v44  ;;  %v600_v60 = vmul.f32 0.125, %v171_v51 }
  0xa2   :  { %v175_v61 = vadd.f32 %v174_v53, %v173_v45  ;;  %v202_v62 = vrot.slane %v201_v54, 2  ;;  %v181_v63 = vadd.f32 %v180_v55, %v179_v47  ;;  %v208_v0 = vrot.slane %v207_v56, 2 }
  0xa3   :  { %v216_v1 = vmul.f32 0.125, %v193_v57  ;;  %v220_v2 = vmul.f32 %v598_v58, %v598_v58  ;;  %v217_v3 = vmul.f32 0.125, %v199_v59  ;;  %v221_v4 = vmul.f32 %v600_v60, %v600_v60 }
  0xa4   :  { %v176_v5 = vrot.slane %v175_v61, 1  ;;  %v203_v6 = vadd.f32 %v202_v62, %v201_v54  ;;  %v182_v8 = vrot.slane %v181_v63, 1  ;;  %v209_v9 = vadd.f32 %v208_v0, %v207_v56 }
  0xa5   :  { %v224_v7 = vsub.f32 %v216_v1, %v220_v2  ;;  %v225_v10 = vsub.f32 %v217_v3, %v221_v4  ;;  %v281_v42 = vperm.slane %v614_v38, 0  ;;  %v297_v45 = vperm.slane %v614_v38, 1 }
  0xa6   :  { %v177_v11 = vadd.f32 %v176_v5, %v175_v61  ;;  %v204_v12 = vrot.slane %v203_v6, 1  ;;  %v183_v14 = vadd.f32 %v182_v8, %v181_v63  ;;  %v210_v15 = vrot.slane %v209_v9, 1 }
  0xa7   :  { %v232_v13 = vadd.f32 1e-05, %v224_v7  ;;  %v233_v16 = vadd.f32 1e-05, %v225_v10  ;;  %v282_v51 = vperm.slane %v614_v38, 2  ;;  %v228_v52 = vsub.f32 %v574_v17, %v598_v58 }
  0xa8   :  { %v205_v19 = vadd.f32 %v204_v12, %v203_v6  ;;  %v606_v20 = vmul.f32 0.125, %v177_v11  ;;  %v211_v21 = vadd.f32 %v210_v15, %v209_v9  ;;  %v608_v22 = vmul.f32 0.125, %v183_v14 }
  0xa9   :  { %421 = vrsqrt.f32 %v232_v13  ;;  %vm252_vm2 = vweird.f32 %v233_v16  ;;  %vm242_vm4 = vweird.f32 %v232_v13  ;;  %v289_v55 = vperm.slane %v281_v42, 0 }
  0xaa   :  { %423 = vrsqrt.f32 %v233_v16  ;;  %v218_v23 = vmul.f32 0.125, %v205_v19  ;;  %v222_v24 = vmul.f32 %v606_v20, %v606_v20  ;;  %v219_v25 = vmul.f32 0.125, %v211_v21 }
  0xab   :  { %v223_v26 = vmul.f32 %v608_v22, %v608_v22  ;;  %v229_v57 = vsub.f32 %v576_v18, %v600_v60  ;;  %v305_v0 = vperm.slane %v297_v45, 1  ;;  %v283_v2 = vperm.slane %v614_v38, 4 }
  0xac   :  { %v226_v27 = vsub.f32 %v218_v23, %v222_v24  ;;  %v290_v3 = vperm.slane %v282_v51, 0  ;;  %v298_v17 = vperm.slane %v614_v38, 3  ;;  %v299_v18 = vperm.slane %v614_v38, 5 }
  0xad   :  { %v227_v28 = vsub.f32 %v219_v25, %v223_v26  ;;  %v230_v60 = vsub.f32 %v586_v35, %v606_v20  ;;  %v291_v10 = vperm.slane %v283_v2, 0  ;;  %v284_v11 = vperm.slane %v614_v38, 6 }
  0xae   :  { %v234_v29 = vadd.f32 1e-05, %v226_v27  ;;  %v306_v15 = vperm.slane %v298_v17, 1  ;;  %v231_v35 = vsub.f32 %v588_v36, %v608_v22  ;;  %v307_v20 = vperm.slane %v299_v18, 1 }
  0xaf   :  { %v422_v30 = vpop.eup %421  ;;  %v235_v31 = vadd.f32 1e-05, %v227_v28  ;;  %v292_v24 = vperm.slane %v284_v11, 0  ;;  %v300_v25 = vperm.slane %v614_v38, 7 }
  0xb0   :  { %v424_v32 = vpop.eup %423  ;;  %v237_v33 = vmul.f32 %v422_v30, %v232_v13  ;;  %425 = vrsqrt.f32 %v234_v29  ;;  %vm243_vm1 = vweird.f32 %v422_v30  ;;  %vm262_vm9 = vweird.f32 %v234_v29 }
  0xb1   :  { %v247_v34 = vmul.f32 %v424_v32, %v233_v16  ;;  %427 = vrsqrt.f32 %v235_v31  ;;  %vm253_vm3 = vweird.f32 %v424_v32  ;;  %vm244_vm5 = vmor %vm242_vm4, %vm243_vm1  ;;  %vm272_vm11 = vweird.f32 %v235_v31 }
  0xb2   :  { %v238_v37 = vmul.f32 %v422_v30, %v237_v33  ;;  %vm254_vm6 = vmor %vm252_vm2, %vm253_vm3 }
  0xb3   :  { %v248_v39 = vmul.f32 %v424_v32, %v247_v34 }
  0xb4   :  { %v239_v40 = vmul.f32 0.5, %v238_v37 }
  0xb5   :  { %v249_v41 = vmul.f32 0.5, %v248_v39 }
  0xb6   :  { %v426_v43 = vpop.eup %425  ;;  %v240_v44 = vsub.f32 1.5, %v239_v40 }
  0xb7   :  { %v428_v46 = vpop.eup %427  ;;  %v250_v47 = vsub.f32 1.5, %v249_v41  ;;  %v257_v48 = vmul.f32 %v426_v43, %v234_v29  ;;  %vm263_vm7 = vweird.f32 %v426_v43 }
  0xb8   :  { %v241_v49 = vmul.f32 %v422_v30, %v240_v44  ;;  %v267_v50 = vmul.f32 %v428_v46, %v235_v31  ;;  %vm273_vm8 = vweird.f32 %v428_v46  ;;  %vm264_vm10 = vmor %vm262_vm9, %vm263_vm7 }
  0xb9   :  { %v251_v53 = vmul.f32 %v424_v32, %v250_v47  ;;  %v258_v54 = vmul.f32 %v426_v43, %v257_v48  ;;  %vm274_vm12 = vmor %vm272_vm11, %vm273_vm8 }
  0xba   :  { %v245_v56 = vsel %vm244_vm5, %v422_v30, %v241_v49  ;;  %v268_v59 = vmul.f32 %v428_v46, %v267_v50  ;;  %v308_v30 = vperm.slane %v300_v25, 1 }
  0xbb   :  { %v276_v61 = vmul.f32 %v245_v56, %v228_v52  ;;  %v255_v62 = vsel %vm254_vm6, %v424_v32, %v251_v53  ;;  %v259_v63 = vmul.f32 0.5, %v258_v54 }
  0xbc   :  { %v269_v1 = vmul.f32 0.5, %v268_v59  ;;  %v277_v58 = vmul.f32 %v255_v62, %v229_v57 }
  0xbd   :  { %v260_v4 = vsub.f32 1.5, %v259_v63  ;;  %v293_v5 = vmul.f32 %v289_v55, %v276_v61 }
  0xbe   :  { %v270_v6 = vsub.f32 1.5, %v269_v1  ;;  %v294_v14 = vmul.f32 %v290_v3, %v277_v58 }
  0xbf   :  { %v261_v7 = vmul.f32 %v426_v43, %v260_v4  ;;  %v628_v8 = vadd.f32 %v305_v0, %v293_v5 }
  0xc0   :  { %v271_v9 = vmul.f32 %v428_v46, %v270_v6  ;;  %v636_v26 = vadd.f32 %v306_v15, %v294_v14 }
  0xc1   :  { %v265_v12 = vsel %vm264_vm10, %v426_v43, %v261_v7  ;;  %v313_v13 = vmul.f32 %v628_v8, %v628_v8 }
  0xc2   :  { %v278_v16 = vmul.f32 %v265_v12, %v230_v60  ;;  %v275_v19 = vsel %vm274_vm12, %v428_v46, %v271_v9  ;;  %v333_v36 = vmul.f32 %v636_v26, %v636_v26 }
  0xc3   :  { %314 = vadd.xlane.f32.xlu0 %v313_v13  ;;  %v279_v21 = vmul.f32 %v275_v19, %v231_v35 }
  0xc4   :  { %v295_v23 = vmul.f32 %v291_v10, %v278_v16 }
  0xc5   :  { %v296_v29 = vmul.f32 %v292_v24, %v279_v21 }
  0xc6   :  { %v638_v27 = vadd.f32 %v307_v20, %v295_v23 }
  0xc7   :  { %v644_v22 = vadd.f32 %v308_v30, %v296_v29 }
  0xc8   :  { %v353_v28 = vmul.f32 %v638_v27, %v638_v27 }
  0xc9   :  { %v373_v31 = vmul.f32 %v644_v22, %v644_v22 }
  0xca   :  { %354 = vadd.xlane.f32.xlu1 %v353_v28 }
  0xcb   :  { %334 = vadd.xlane.f32.xlu0 %v333_v36 }
  0xd2   :  { %374 = vadd.xlane.f32.xlu1 %v373_v31 }
 0x136   :  { %v315_v32 = vpop.xlane.xlu0 %314 }
 0x137   :  { %v316_v33 = vadd.f32 1.0, %v315_v32  ;;  %v317_v34 = vadd.f32 1e-07, %v315_v32 }
 0x139   :  { %v318_v37 = vmul.f32 %v317_v34, %v316_v33 }
 0x13b   :  { %v319_v38 = vmul.f32 %v318_v37, %v316_v33 }
 0x13d   :  { %429 = vrsqrt.f32 %v319_v38  ;;  %v355_v39 = vpop.xlane.xlu1 %354  ;;  %vm326_vm14 = vweird.f32 %v319_v38 }
 0x13e   :  { %v356_v40 = vadd.f32 1.0, %v355_v39  ;;  %v357_v41 = vadd.f32 1e-07, %v355_v39  ;;  %v335_v42 = vpop.xlane.xlu0 %334 }
 0x13f   :  { %v336_v43 = vadd.f32 1.0, %v335_v42  ;;  %v337_v44 = vadd.f32 1e-07, %v335_v42 }
 0x140   :  { %v358_v45 = vmul.f32 %v357_v41, %v356_v40 }
 0x141   :  { %v338_v46 = vmul.f32 %v337_v44, %v336_v43 }
 0x142   :  { %v359_v47 = vmul.f32 %v358_v45, %v356_v40 }
 0x143   :  { %v430_v48 = vpop.eup %429  ;;  %v339_v49 = vmul.f32 %v338_v46, %v336_v43 }
 0x144   :  { %v321_v50 = vmul.f32 %v430_v48, %v319_v38  ;;  %431 = vrsqrt.f32 %v359_v47  ;;  %vm327_vm13 = vweird.f32 %v430_v48  ;;  %vm366_vm2 = vweird.f32 %v359_v47 }
 0x145   :  { %433 = vrsqrt.f32 %v339_v49  ;;  %v375_v51 = vpop.xlane.xlu1 %374  ;;  %vm328_vm15 = vmor %vm326_vm14, %vm327_vm13  ;;  %vm346_vm4 = vweird.f32 %v339_v49 }
 0x146   :  { %v322_v52 = vmul.f32 %v430_v48, %v321_v50  ;;  %v376_v53 = vadd.f32 1.0, %v375_v51  ;;  %v377_v54 = vadd.f32 1e-07, %v375_v51 }
 0x148   :  { %v323_v55 = vmul.f32 0.5, %v322_v52  ;;  %v378_v56 = vmul.f32 %v377_v54, %v376_v53 }
 0x14a   :  { %v432_v57 = vpop.eup %431  ;;  %v324_v59 = vsub.f32 1.5, %v323_v55  ;;  %v379_v61 = vmul.f32 %v378_v56, %v376_v53 }
 0x14b   :  { %v434_v62 = vpop.eup %433  ;;  %v361_v63 = vmul.f32 %v432_v57, %v359_v47  ;;  %vm367_vm0 = vweird.f32 %v432_v57 }
 0x14c   :  { %v325_v0 = vmul.f32 %v430_v48, %v324_v59  ;;  %v341_v1 = vmul.f32 %v434_v62, %v339_v49  ;;  %435 = vrsqrt.f32 %v379_v61  ;;  %vm347_vm1 = vweird.f32 %v434_v62  ;;  %vm368_vm3 = vmor %vm366_vm2, %vm367_vm0 }
 0x14d   :  { %v362_v2 = vmul.f32 %v432_v57, %v361_v63  ;;  %vm348_vm5 = vmor %vm346_vm4, %vm347_vm1  ;;  %vm386_vm7 = vweird.f32 %v379_v61 }
 0x14e   :  { %v329_v3 = vsel %vm328_vm15, %v430_v48, %v325_v0  ;;  %v342_v17 = vmul.f32 %v434_v62, %v341_v1 }
 0x14f   :  { %v330_v58 = vmul.f32 %v329_v3, %v315_v32  ;;  %v363_v4 = vmul.f32 0.5, %v362_v2 }
 0x150   :  { %v343_v5 = vmul.f32 0.5, %v342_v17 }
 0x151   :  { %v331_v6 = vmul.f32 %v330_v58, %v628_v8  ;;  %v364_v18 = vsub.f32 1.5, %v363_v4 }
 0x152   :  { %v436_v60 = vpop.eup %435  ;;  %v344_v7 = vsub.f32 1.5, %v343_v5 }
 0x153   :  { %332 = vst [vmem:[#allocation8] sm:$0xff] %v331_v6  ;;  %v365_v9 = vmul.f32 %v432_v57, %v364_v18  ;;  %v381_v10 = vmul.f32 %v436_v60, %v379_v61  ;;  %vm387_vm6 = vweird.f32 %v436_v60 }
 0x154   :  { %v345_v11 = vmul.f32 %v434_v62, %v344_v7  ;;  %vm388_vm8 = vmor %vm386_vm7, %vm387_vm6 }
 0x155   :  { %v369_v12 = vsel %vm368_vm3, %v432_v57, %v365_v9  ;;  %v382_v13 = vmul.f32 %v436_v60, %v381_v10 }
 0x156   :  { %v370_v14 = vmul.f32 %v369_v12, %v355_v39  ;;  %v349_v15 = vsel %vm348_vm5, %v434_v62, %v345_v11 }
 0x157   :  { %v350_v16 = vmul.f32 %v349_v15, %v335_v42  ;;  %v383_v35 = vmul.f32 0.5, %v382_v13 }
 0x158   :  { %v371_v8 = vmul.f32 %v370_v14, %v638_v27 }
 0x159   :  { %v351_v19 = vmul.f32 %v350_v16, %v636_v26  ;;  %v384_v20 = vsub.f32 1.5, %v383_v35 }
 0x15a   :  { %372 = vst [vmem:[#allocation8 + $0x10] sm:$0xff] %v371_v8 }
 0x15b   :  { %352 = vst [vmem:[#allocation8 + $0x8] sm:$0xff] %v351_v19  ;;  %v385_v21 = vmul.f32 %v436_v60, %v384_v20 }
 0x15d   :  { %v389_v23 = vsel %vm388_vm8, %v436_v60, %v385_v21 }
 0x15e   :  { %v390_v24 = vmul.f32 %v389_v23, %v375_v51 }
 0x160   :  { %v391_v25 = vmul.f32 %v390_v24, %v644_v22 }
 0x162   :  { %392 = vst [vmem:[#allocation8 + $0x18] sm:$0xff] %v391_v25 }
 0x163   :  { %403 = dma.vmem_to_hbm [thread:$0]  %s399_s2, 512, %s401_s30, [#allocation4]  }
 0x164   :  { %537 = dma.done.wait [#allocation4], 512  }
 0x165   :  { %538 = vsyncadd [#allocation4], 4294966784 }
 0x166   :  { %408 = vsyncpa [#allocation3], 1 }
 0x167   :  { %409 = vsyncpa [#allocation6], 1 }
 0x168   :  { %410 = vsyncpa [#allocation4], 1 }

</bundles_post_ra>
